<compile_context>
chip_gen: v5e
topology: v5e:2x2
jax: 0.10.0
libtpu: 0.0.40
codegen_flags: <defaults>
</compile_context>

<pallas_src>
import functools

import jax
import jax.numpy as jnp
from jax import lax
from jax.experimental import pallas as pl
from jax.experimental.pallas import tpu as pltpu

_INV_SQRT2 = 0.7071067811865476


def _gelu_f32(h):
    # Exact erf-GELU (torch.nn.GELU default), evaluated in f32.
    return 0.5 * h * (1.0 + lax.erf(h * jnp.float32(_INV_SQRT2)))


# ---------------------------------------------------------------------------
# Kernel A: weights resident in VMEM (constant index maps, 1-D row grid).
# The hidden dim is sub-chunked with a static loop, breaking the
# fc1 -> GELU -> fc2 dependency into independent per-chunk chains so the LLO
# scheduler can overlap GELU (VPU/EUP) of chunk j with MXU work of chunk j+1.
# ---------------------------------------------------------------------------
def _mlp_resident_kernel(x_ref, w1_ref, b1_ref, w2_ref, b2_ref, o_ref, *, n_sub):
    x = x_ref[...].astype(jnp.bfloat16)          # in-kernel cast: saves an HBM pass
    tm = x_ref.shape[0]
    H = w1_ref.shape[1]
    d_out = w2_ref.shape[1]
    th = H // n_sub
    acc = jnp.zeros((tm, d_out), jnp.float32)
    for j in range(n_sub):                       # static, 128-aligned slices
        w1_c = w1_ref[:, j * th:(j + 1) * th]
        b1_c = b1_ref[:, j * th:(j + 1) * th]
        w2_c = w2_ref[j * th:(j + 1) * th, :]
        h = jnp.dot(x, w1_c, preferred_element_type=jnp.float32) + b1_c
        h = _gelu_f32(h)
        acc = acc + jnp.dot(h.astype(jnp.bfloat16), w2_c,
                            preferred_element_type=jnp.float32)
    o_ref[...] = (acc + b2_ref[...]).astype(o_ref.dtype)


# ---------------------------------------------------------------------------
# Kernel B: hidden dim streamed over a second ("arbitrary") grid axis.
# f32 output: accumulate directly into the resident o_ref block (no scratch).
# ---------------------------------------------------------------------------
def _mlp_streamed_kernel_f32out(x_ref, w1_ref, b1_ref, w2_ref, b2_ref, o_ref):
    k = pl.program_id(1)

    @pl.when(k == 0)
    def _():
        o_ref[...] = jnp.zeros_like(o_ref)

    x = x_ref[...].astype(jnp.bfloat16)
    h = jnp.dot(x, w1_ref[...], preferred_element_type=jnp.float32) + b1_ref[...]
    h = _gelu_f32(h)
    o_ref[...] += jnp.dot(h.astype(jnp.bfloat16), w2_ref[...],
                          preferred_element_type=jnp.float32)

    @pl.when(k == pl.num_programs(1) - 1)
    def _():
        o_ref[...] += b2_ref[...]


# Kernel B': non-f32 outputs keep an f32 VMEM scratch accumulator.
def _mlp_streamed_kernel_scratch(x_ref, w1_ref, b1_ref, w2_ref, b2_ref, o_ref,
                                 acc_ref):
    k = pl.program_id(1)

    @pl.when(k == 0)
    def _():
        acc_ref[...] = jnp.zeros_like(acc_ref)

    x = x_ref[...].astype(jnp.bfloat16)
    h = jnp.dot(x, w1_ref[...], preferred_element_type=jnp.float32) + b1_ref[...]
    h = _gelu_f32(h)
    acc_ref[...] += jnp.dot(h.astype(jnp.bfloat16), w2_ref[...],
                            preferred_element_type=jnp.float32)

    @pl.when(k == pl.num_programs(1) - 1)
    def _():
        o_ref[...] = (acc_ref[...] + b2_ref[...]).astype(o_ref.dtype)


# ---------------------------------------------------------------------------
# Wrapper
# ---------------------------------------------------------------------------
def _round_up(a, b):
    return (a + b - 1) // b * b


def _vmem_capacity_bytes():
    try:
        return int(pltpu.get_tpu_info().vmem_capacity_bytes)
    except Exception:
        return 64 << 20  # conservative fallback: v7x per-TensorCore VMEM


def _pick_tm(M, tm):
    """Row-tile: 8-aligned; give the 'parallel' row axis >=2 tiles when there
    is enough work (megacore sharding on v7x)."""
    if M > tm:
        return tm
    if M >= 512:
        return _round_up((M + 1) // 2, 8)
    return _round_up(M, 8)


def _resident_vmem_need(tm, d_in, H, d_out, n_sub, x_item, out_item):
    need = 2 * (d_in * H + H * d_out) * 2        # bf16 weights (x2 buffering slack)
    need += 2 * tm * d_in * x_item               # x blocks (double-buffered)
    need += 2 * tm * d_out * out_item            # out blocks
    need += 2 * (H + d_out) * 4                  # biases
    need += tm * (H // n_sub) * 4                # f32 hidden chunk temp
    need += tm * d_out * 4                       # f32 accumulator value
    return need


def _streamed_vmem_need(tm, th, d_in, d_out, x_item, out_item, f32_out):
    need = 2 * tm * d_in * x_item                # x blocks
    need += 2 * d_in * th * 2                    # w1 blocks (bf16)
    need += 2 * th * d_out * 2                   # w2 blocks (bf16)
    need += 2 * tm * d_out * out_item            # out blocks
    need += 2 * (th + d_out) * 4                 # biases
    need += tm * th * 4                          # f32 hidden temp
    if not f32_out:
        need += tm * d_out * 4                   # f32 scratch accumulator
    return need


def mlp_pallas(x, w1, b1, w2, b2, *, tm=None, th=512, mode="auto"):
    """x: (B, N, D_in). w1: (D_in, H), b1: (H,), w2: (H, D_out), b2: (D_out,).
    Returns (B, N, D_out) in x.dtype.  mode in {"auto", "resident", "streamed"}."""
    orig_dtype = x.dtype
    B, N, D_in = x.shape
    H = w1.shape[1]
    D_out = w2.shape[1]
    M = B * N
    x_item = jnp.dtype(orig_dtype).itemsize
    out_item = x_item
    f32_out = orig_dtype == jnp.float32

    vmem_cap = _vmem_capacity_bytes()
    vmem_budget = int(0.70 * vmem_cap)

    # Hidden sub-chunk count for the resident kernel (128-aligned chunks).
    n_sub = 1
    for cand in (4, 2):
        if H % cand == 0 and (H // cand) % 128 == 0:
            n_sub = cand
            break

    tm_res = _pick_tm(M, 256 if tm is None else tm)
    resident_need = _resident_vmem_need(tm_res, D_in, H, D_out, n_sub,
                                        x_item, out_item)
    if mode == "auto":
        mode = "resident" if resident_need <= vmem_budget else "streamed"

    x2 = x.reshape(M, D_in)                      # kept in original dtype
    w1_bf = w1.astype(jnp.bfloat16)
    w2_bf = w2.astype(jnp.bfloat16)
    b1_f = b1.astype(jnp.float32)
    b2_2 = b2.reshape(1, D_out).astype(jnp.float32)

    if mode == "resident":
        tm_eff = tm_res
        M_pad = _round_up(M, tm_eff)
        if M_pad != M:
            x2 = jnp.pad(x2, ((0, M_pad - M), (0, 0)))
        b1_2 = b1_f.reshape(1, H)

        vmem_limit = max(32 << 20, min(int(1.3 * resident_need) + (4 << 20),
                                       int(0.9 * vmem_cap)))
        cost = pl.CostEstimate(
            flops=2 * M_pad * (D_in * H + H * D_out),
            transcendentals=M_pad * H,
            bytes_accessed=(M_pad * D_in * x_item
                            + (D_in * H + H * D_out) * 2       # weights once
                            + (H + D_out) * 4
                            + M_pad * D_out * out_item),
        )

        out = pl.pallas_call(
            functools.partial(_mlp_resident_kernel, n_sub=n_sub),
            out_shape=jax.ShapeDtypeStruct((M_pad, D_out), orig_dtype),
            grid_spec=pltpu.PrefetchScalarGridSpec(
                num_scalar_prefetch=0,
                grid=(M_pad // tm_eff,),
                in_specs=[
                    pl.BlockSpec((tm_eff, D_in), lambda i: (i, 0)),
                    pl.BlockSpec((D_in, H), lambda i: (0, 0)),    # resident
                    pl.BlockSpec((1, H), lambda i: (0, 0)),       # resident
                    pl.BlockSpec((H, D_out), lambda i: (0, 0)),   # resident
                    pl.BlockSpec((1, D_out), lambda i: (0, 0)),   # resident
                ],
                out_specs=pl.BlockSpec((tm_eff, D_out), lambda i: (i, 0)),
            ),
            compiler_params=pltpu.CompilerParams(
                dimension_semantics=("parallel",),
                vmem_limit_bytes=vmem_limit,
            ),
            cost_estimate=cost,
        )(x2, w1_bf, b1_2, w2_bf, b2_2)

    else:  # "streamed": hidden dim chunked over an "arbitrary" grid axis
        tm_eff = _pick_tm(M, 512 if tm is None else tm)
        th_eff = _round_up(min(th, _round_up(H, 128)), 128)
        # Shrink tiles until the working set fits the VMEM budget.
        while (_streamed_vmem_need(tm_eff, th_eff, D_in, D_out, x_item,
                                   out_item, f32_out) > vmem_budget
               and th_eff > 128):
            th_eff //= 2
        while (_streamed_vmem_need(tm_eff, th_eff, D_in, D_out, x_item,
                                   out_item, f32_out) > vmem_budget
               and tm_eff > 64):
            tm_eff = _round_up(tm_eff // 2, 8)

        M_pad = _round_up(M, tm_eff)
        if M_pad != M:
            x2 = jnp.pad(x2, ((0, M_pad - M), (0, 0)))

        # Zero-pad the hidden dim to a tile multiple (exact: padded fc1 columns
        # give GELU(0) = 0, which multiplies all-zero padded fc2 rows).
        H_pad = _round_up(H, th_eff)
        if H_pad != H:
            w1_bf = jnp.pad(w1_bf, ((0, 0), (0, H_pad - H)))
            b1_f = jnp.pad(b1_f, (0, H_pad - H))
            w2_bf = jnp.pad(w2_bf, ((0, H_pad - H), (0, 0)))
        b1_2 = b1_f.reshape(1, H_pad)

        need = _streamed_vmem_need(tm_eff, th_eff, D_in, D_out, x_item,
                                   out_item, f32_out)
        vmem_limit = max(32 << 20, min(int(1.3 * need) + (4 << 20),
                                       int(0.9 * vmem_cap)))

        n_row = M_pad // tm_eff
        grid = (n_row, H_pad // th_eff)
        cost = pl.CostEstimate(
            flops=2 * M_pad * (D_in * H_pad + H_pad * D_out),
            transcendentals=M_pad * H_pad,
            bytes_accessed=(M_pad * D_in * x_item
                            + n_row * (D_in * H_pad + H_pad * D_out) * 2
                            + n_row * (H_pad + D_out) * 4
                            + M_pad * D_out * out_item),
        )

        in_specs = [
            pl.BlockSpec((tm_eff, D_in), lambda i, k: (i, 0)),
            pl.BlockSpec((D_in, th_eff), lambda i, k: (0, k)),
            pl.BlockSpec((1, th_eff), lambda i, k: (0, k)),
            pl.BlockSpec((th_eff, D_out), lambda i, k: (k, 0)),
            pl.BlockSpec((1, D_out), lambda i, k: (0, 0)),
        ]
        out_spec = pl.BlockSpec((tm_eff, D_out), lambda i, k: (i, 0))

        if f32_out:
            kernel = _mlp_streamed_kernel_f32out
            scratch_shapes = []
        else:
            kernel = _mlp_streamed_kernel_scratch
            scratch_shapes = [pltpu.VMEM((tm_eff, D_out), jnp.float32)]

        out = pl.pallas_call(
            kernel,
            out_shape=jax.ShapeDtypeStruct((M_pad, D_out), orig_dtype),
            grid_spec=pltpu.PrefetchScalarGridSpec(
                num_scalar_prefetch=0,
                grid=grid,
                in_specs=in_specs,
                out_specs=out_spec,
                scratch_shapes=scratch_shapes,
            ),
            compiler_params=pltpu.CompilerParams(
                dimension_semantics=("parallel", "arbitrary"),
                vmem_limit_bytes=vmem_limit,
            ),
            cost_estimate=cost,
        )(x2, w1_bf, b1_2, w2_bf, b2_2)

    if M_pad != M:
        out = out[:M]
    return out.reshape(B, N, D_out)


# ---------------------------------------------------------------------------
# Reference + test harness
# ---------------------------------------------------------------------------
def _init_linear(key, fan_in, fan_out):
    # Deterministic init mimicking torch.nn.Linear (uniform +- 1/sqrt(fan_in)).
    kw, kb = jax.random.split(key)
    bound = 1.0 / (fan_in ** 0.5)
    w = jax.random.uniform(kw, (fan_in, fan_out), jnp.float32, -bound, bound)
    b = jax.random.uniform(kb, (fan_out,), jnp.float32, -bound, bound)
    return w, b


def mlp_reference(x, w1, b1, w2, b2):
    h = jnp.einsum("bnd,dh->bnh", x, w1) + b1
    h = 0.5 * h * (1.0 + lax.erf(h / jnp.sqrt(2.0)))
    return jnp.einsum("bnh,ho->bno", h, w2) + b2


if __name__ == "__main__":
    key = jax.random.PRNGKey(0)
    k_x, k_fc1, k_fc2 = jax.random.split(key, 3)

    # Small, tile-friendly shapes: batch=2, seq=8, in=128, hidden=256, out=128.
    B, N, D_in, H, D_out = 2, 8, 128, 256, 128

    x = jax.random.normal(k_x, (B, N, D_in), jnp.float32)
    w1, b1 = _init_linear(k_fc1, D_in, H)
    w2, b2 = _init_linear(k_fc2, H, D_out)

    y_ref = mlp_reference(x, w1, b1, w2, b2)

    # 1) Auto mode -> weights-resident kernel (sub-chunked GELU/MXU overlap).
    y = mlp_pallas(x, w1, b1, w2, b2)
    y = jax.block_until_ready(y)
    assert y.shape == (B, N, D_out)
    assert jnp.allclose(y, y_ref, atol=2e-2, rtol=2e-2), "mismatch (resident)"

    # 2) Streamed-weights path, f32 output accumulated in-place in o_ref;
    #    small tiles exercise multi-row-tile + multi-hidden-chunk pl.when logic.
    y2 = mlp_pallas(x, w1, b1, w2, b2, tm=8, th=128, mode="streamed")
    y2 = jax.block_until_ready(y2)
    assert jnp.allclose(y2, y_ref, atol=2e-2, rtol=2e-2), "mismatch (streamed f32)"

    # 3) Streamed-weights path with bf16 I/O -> f32 VMEM scratch accumulator.
    y3 = mlp_pallas(x.astype(jnp.bfloat16), w1, b1, w2, b2, th=128,
                    mode="streamed")
    y3 = jax.block_until_ready(y3)
    assert y3.dtype == jnp.bfloat16
    assert jnp.allclose(y3.astype(jnp.float32), y_ref, atol=6e-2, rtol=6e-2), \
        "mismatch (streamed bf16)"

    print("KERNEL_OK")
</pallas_src>

<mosaic_0001>
module attributes {stable_mosaic.version = 11 : i64} {
  func.func @_mlp_resident_kernel(%arg0: i32, %arg1: memref<16x128xf32, #tpu.memory_space<vmem>>, %arg2: memref<128x256xbf16, #tpu.memory_space<vmem>>, %arg3: memref<1x256xf32, #tpu.memory_space<vmem>>, %arg4: memref<256x128xbf16, #tpu.memory_space<vmem>>, %arg5: memref<1x128xf32, #tpu.memory_space<vmem>>, %arg6: memref<16x128xf32, #tpu.memory_space<vmem>>) attributes {dimension_semantics = [#tpu.dimension_semantics<parallel>], iteration_bounds = array<i64: 1>, scalar_prefetch = 0 : i64, scratch_operands = 0 : i64, tpu.core_type = #tpu.core_type<tc>, window_params = [{transform_indices = @transform_0, window_bounds = array<i64: 16, 128>}, {pipeline_mode = #tpu.pipeline_mode<synchronous>, transform_indices = @transform_1, window_bounds = array<i64: 128, 256>}, {pipeline_mode = #tpu.pipeline_mode<synchronous>, transform_indices = @transform_2, window_bounds = array<i64: 1, 256>}, {pipeline_mode = #tpu.pipeline_mode<synchronous>, transform_indices = @transform_3, window_bounds = array<i64: 256, 128>}, {pipeline_mode = #tpu.pipeline_mode<synchronous>, transform_indices = @transform_4, window_bounds = array<i64: 1, 128>}, {transform_indices = @transform_5, window_bounds = array<i64: 16, 128>}]} {
    %c0 = arith.constant 0 : index
    %c0_0 = arith.constant 0 : index
    %0 = vector.load %arg1[%c0, %c0_0] : memref<16x128xf32, #tpu.memory_space<vmem>>, vector<16x128xf32>
    %1 = arith.truncf %0 : vector<16x128xf32> to vector<16x128xbf16>
    %cst = arith.constant 0.000000e+00 : f32
    %2 = vector.broadcast %cst : f32 to vector<16x128xf32>
    %c0_1 = arith.constant 0 : index
    %c0_2 = arith.constant 0 : index
    %3 = vector.load %arg2[%c0_1, %c0_2] : memref<128x256xbf16, #tpu.memory_space<vmem>>, vector<128x128xbf16>
    %c0_3 = arith.constant 0 : index
    %c0_4 = arith.constant 0 : index
    %4 = vector.load %arg3[%c0_3, %c0_4] : memref<1x256xf32, #tpu.memory_space<vmem>>, vector<1x128xf32>
    %c0_5 = arith.constant 0 : index
    %c0_6 = arith.constant 0 : index
    %5 = vector.load %arg4[%c0_5, %c0_6] : memref<256x128xbf16, #tpu.memory_space<vmem>>, vector<128x128xbf16>
    %cst_7 = arith.constant dense<0.000000e+00> : vector<16x128xf32>
    %6 = tpu.matmul %1, %3, %cst_7 {dimension_numbers = #tpu.dot_dimension_numbers<[1], [0], [0], [1], [0, 0, 1, 1], [], []>} : vector<16x128xbf16>, vector<128x128xbf16>, vector<16x128xf32> -> vector<16x128xf32>
    %7 = vector.broadcast %4 : vector<1x128xf32> to vector<16x128xf32>
    %8 = arith.addf %6, %7 : vector<16x128xf32>
    %cst_8 = arith.constant 5.000000e-01 : f32
    %9 = vector.broadcast %cst_8 : f32 to vector<16x128xf32>
    %10 = arith.mulf %9, %8 : vector<16x128xf32>
    %cst_9 = arith.constant 0.707106769 : f32
    %11 = vector.broadcast %cst_9 : f32 to vector<16x128xf32>
    %12 = arith.mulf %8, %11 : vector<16x128xf32>
    %13 = math.erf %12 : vector<16x128xf32>
    %cst_10 = arith.constant 1.000000e+00 : f32
    %14 = vector.broadcast %cst_10 : f32 to vector<16x128xf32>
    %15 = arith.addf %14, %13 : vector<16x128xf32>
    %16 = arith.mulf %10, %15 : vector<16x128xf32>
    %17 = arith.truncf %16 : vector<16x128xf32> to vector<16x128xbf16>
    %cst_11 = arith.constant dense<0.000000e+00> : vector<16x128xf32>
    %18 = tpu.matmul %17, %5, %cst_11 {dimension_numbers = #tpu.dot_dimension_numbers<[1], [0], [0], [1], [0, 0, 1, 1], [], []>} : vector<16x128xbf16>, vector<128x128xbf16>, vector<16x128xf32> -> vector<16x128xf32>
    %19 = arith.addf %2, %18 : vector<16x128xf32>
    %c0_12 = arith.constant 0 : index
    %c128 = arith.constant 128 : index
    %20 = vector.load %arg2[%c0_12, %c128] : memref<128x256xbf16, #tpu.memory_space<vmem>>, vector<128x128xbf16>
    %c0_13 = arith.constant 0 : index
    %c128_14 = arith.constant 128 : index
    %21 = vector.load %arg3[%c0_13, %c128_14] : memref<1x256xf32, #tpu.memory_space<vmem>>, vector<1x128xf32>
    %c128_15 = arith.constant 128 : index
    %c0_16 = arith.constant 0 : index
    %22 = vector.load %arg4[%c128_15, %c0_16] : memref<256x128xbf16, #tpu.memory_space<vmem>>, vector<128x128xbf16>
    %cst_17 = arith.constant dense<0.000000e+00> : vector<16x128xf32>
    %23 = tpu.matmul %1, %20, %cst_17 {dimension_numbers = #tpu.dot_dimension_numbers<[1], [0], [0], [1], [0, 0, 1, 1], [], []>} : vector<16x128xbf16>, vector<128x128xbf16>, vector<16x128xf32> -> vector<16x128xf32>
    %24 = vector.broadcast %21 : vector<1x128xf32> to vector<16x128xf32>
    %25 = arith.addf %23, %24 : vector<16x128xf32>
    %cst_18 = arith.constant 5.000000e-01 : f32
    %26 = vector.broadcast %cst_18 : f32 to vector<16x128xf32>
    %27 = arith.mulf %26, %25 : vector<16x128xf32>
    %cst_19 = arith.constant 0.707106769 : f32
    %28 = vector.broadcast %cst_19 : f32 to vector<16x128xf32>
    %29 = arith.mulf %25, %28 : vector<16x128xf32>
    %30 = math.erf %29 : vector<16x128xf32>
    %cst_20 = arith.constant 1.000000e+00 : f32
    %31 = vector.broadcast %cst_20 : f32 to vector<16x128xf32>
    %32 = arith.addf %31, %30 : vector<16x128xf32>
    %33 = arith.mulf %27, %32 : vector<16x128xf32>
    %34 = arith.truncf %33 : vector<16x128xf32> to vector<16x128xbf16>
    %cst_21 = arith.constant dense<0.000000e+00> : vector<16x128xf32>
    %35 = tpu.matmul %34, %22, %cst_21 {dimension_numbers = #tpu.dot_dimension_numbers<[1], [0], [0], [1], [0, 0, 1, 1], [], []>} : vector<16x128xbf16>, vector<128x128xbf16>, vector<16x128xf32> -> vector<16x128xf32>
    %36 = arith.addf %19, %35 : vector<16x128xf32>
    %c0_22 = arith.constant 0 : index
    %c0_23 = arith.constant 0 : index
    %37 = vector.load %arg5[%c0_22, %c0_23] : memref<1x128xf32, #tpu.memory_space<vmem>>, vector<1x128xf32>
    %38 = vector.broadcast %37 : vector<1x128xf32> to vector<16x128xf32>
    %39 = arith.addf %36, %38 : vector<16x128xf32>
    %c0_24 = arith.constant 0 : index
    %c0_25 = arith.constant 0 : index
    %40 = vector.load %arg6[%c0_24, %c0_25] : memref<16x128xf32, #tpu.memory_space<vmem>>, vector<16x128xf32>
    tpu.vector_store %arg6[%c0_24, %c0_25], %39 {strides = array<i32>} : memref<16x128xf32, #tpu.memory_space<vmem>>, vector<16x128xf32>,
    return
  }
  func.func @transform_0(%arg0: i32) -> (i32, i32) {
    %c0_i32 = arith.constant 0 : i32
    %c0_i32_0 = arith.constant 0 : i32
    return %arg0, %c0_i32 : i32, i32
  }
  func.func @transform_1(%arg0: i32) -> (i32, i32) {
    %c0_i32 = arith.constant 0 : i32
    %c0_i32_0 = arith.constant 0 : i32
    %c0_i32_1 = arith.constant 0 : i32
    return %c0_i32, %c0_i32_0 : i32, i32
  }
  func.func @transform_2(%arg0: i32) -> (i32, i32) {
    %c0_i32 = arith.constant 0 : i32
    %c0_i32_0 = arith.constant 0 : i32
    %c0_i32_1 = arith.constant 0 : i32
    return %c0_i32, %c0_i32_0 : i32, i32
  }
  func.func @transform_3(%arg0: i32) -> (i32, i32) {
    %c0_i32 = arith.constant 0 : i32
    %c0_i32_0 = arith.constant 0 : i32
    %c0_i32_1 = arith.constant 0 : i32
    return %c0_i32, %c0_i32_0 : i32, i32
  }
  func.func @transform_4(%arg0: i32) -> (i32, i32) {
    %c0_i32 = arith.constant 0 : i32
    %c0_i32_0 = arith.constant 0 : i32
    %c0_i32_1 = arith.constant 0 : i32
    return %c0_i32, %c0_i32_0 : i32, i32
  }
  func.func @transform_5(%arg0: i32) -> (i32, i32) {
    %c0_i32 = arith.constant 0 : i32
    %c0_i32_0 = arith.constant 0 : i32
    return %arg0, %c0_i32 : i32, i32
  }
}

</mosaic_0001>

<bundles_post_ra>
// kernel: tpu_custom_call.1
= control target key start
LH: loop header
LB: loop body
LE: loop exit
PB: predicated region body
PF: predicated region fallthrough
CT: control target
= control target key end

     0   :  { %10 = vsyncpa [#allocation3], 0  ;;  %s1101_s0 = inlined_call_operand.hbm [shape: f32[16,128], index: 0, kind: input, shape index: {}]   ;;  %s1102_s1 = inlined_call_operand.hbm [shape: bf16[128,256], index: 1, kind: input, shape index: {}]   ;;  %s1103_s2 = inlined_call_operand.hbm [shape: f32[1,256], index: 2, kind: input, shape index: {}]   ;;  %s1104_s3 = inlined_call_operand.hbm [shape: bf16[256,128], index: 3, kind: input, shape index: {}]   ;;  %s1105_s4 = inlined_call_operand.vmem [shape: f32[1,128], index: 4, kind: input, shape index: {}]   ;;  %s1106_s5 = inlined_call_operand.hbm [shape: f32[16,128], index: 5, kind: output, shape index: {}]  }
   0x1   :  { %11 = vsyncpa [#allocation6], 0 }
   0x2   :  { %12 = vsyncpa [#allocation9], 0 }
   0x3   :  { %13 = vsyncpa [#allocation4], 0  ;;  %s31_s20 = sshll.u32 %s1102_s1, 4  ;;  %s924_s21 = smov [#allocation5]   ;;  %s32_s20 = int_to_ptr.hbm [resolvable:$true] %s31_s20 }
   0x4   :  { %s33_s22 = sshll.u32 %s924_s21, 4  ;;  %s18_s25 = sshll.u32 %s1101_s0, 4  ;;  %s34_s22 = int_to_ptr.vmem [resolvable:$true] %s33_s22  ;;  %s19_s25 = int_to_ptr.hbm [resolvable:$true] %s18_s25 }
   0x5   :  { %s925_s26 = smov 128   ;;  %s926_s27 = smov 8  }
   0x6   :  { %39 = dma.hbm_to_vmem [thread:$0]  %s32_s20, 2048, %s34_s22, [#allocation6], %s925_s26, %s925_s26, %s926_s27  }
   0x7   :  { %s927_s28 = smov [#allocation2]   ;;  %s45_s1 = sshll.u32 %s1103_s2, 4  ;;  %s46_s1 = int_to_ptr.hbm [resolvable:$true] %s45_s1 }
   0x8   :  { %s20_s29 = sshll.u32 %s927_s28, 4  ;;  %s55_s8 = sshll.u32 %s1104_s3, 4  ;;  %s21_s29 = int_to_ptr.vmem [resolvable:$true] %s20_s29  ;;  %s56_s8 = int_to_ptr.hbm [resolvable:$true] %s55_s8 }
   0x9   :  { %26 = dma.hbm_to_vmem [thread:$0]  %s19_s25, 256, %s21_s29, [#allocation3], %s925_s26, %s925_s26, %s926_s27  }
   0xa   :  { %s928_s9 = smov [#allocation7]   ;;  %s929_s11 = smov [#allocation8]  }
   0xb   :  { %s47_s10 = sshll.u32 %s928_s9, 4  ;;  %s57_s12 = sshll.u32 %s929_s11, 4  ;;  %s48_s10 = int_to_ptr.vmem [resolvable:$true] %s47_s10  ;;  %s58_s12 = int_to_ptr.vmem [resolvable:$true] %s57_s12 }
   0xc   :  { %50 = dma.hbm_to_vmem [thread:$0]  %s46_s1, 32, %s48_s10, [#allocation6]  }
   0xd   :  { %s930_s13 = smov 64   ;;  %s931_s2 = smov 4  }
   0xe   :  { %63 = dma.hbm_to_vmem [thread:$0]  %s56_s8, 2048, %s58_s12, [#allocation9], %s930_s13, %s930_s13, %s931_s2  }
   0xf   :  { %916 = dma.done.wait [#allocation3], 256  }
  0x10   :  { %917 = vsyncadd [#allocation3], 4294967040 }
  0x11   :  { %918 = dma.done.wait [#allocation6], 2080  }
  0x12   :  { %919 = vsyncadd [#allocation6], 4294965216 }
  0x13   :  { %920 = dma.done.wait [#allocation9], 2048  }
  0x14   :  { %921 = vsyncadd [#allocation9], 4294965248  ;;  %v642_v0 = vld [vmem:[#allocation5 + $0x70] sm:$0xf]  ;;  %v751_v1 = vld [vmem:[#allocation5 + $0x74] sm:$0xf0] }
  0x15   :  { %v676_v2 = vld [vmem:[#allocation5 + $0x74] sm:$0xf]  ;;  %v643_v3 = vor.u32 %v751_v1, %v642_v0  ;;  %v767_v4 = vld [vmem:[#allocation5 + $0x78] sm:$0xf0]  ;;  %v638_v5 = vld [vmem:[#allocation5 + $0x60] sm:$0xf] }
  0x16   :  { %v750_v6 = vld [vmem:[#allocation5 + $0x64] sm:$0xf0]  ;;  %v677_v7 = vor.u32 %v767_v4, %v676_v2  ;;  %v672_v8 = vld [vmem:[#allocation5 + $0x64] sm:$0xf]  ;;  %v766_v9 = vld [vmem:[#allocation5 + $0x68] sm:$0xf0] }
  0x17   :  { %169 = vmatpush.bf16.msra.mxu0 %v643_v3  ;;  %v639_v10 = vor.u32 %v750_v6, %v638_v5  ;;  %v673_v11 = vor.u32 %v766_v9, %v672_v8  ;;  %v634_v12 = vld [vmem:[#allocation5 + $0x50] sm:$0xf]  ;;  %v749_v13 = vld [vmem:[#allocation5 + $0x54] sm:$0xf0]  ;;  %v668_v14 = vld [vmem:[#allocation5 + $0x54] sm:$0xf] }
  0x18   :  { %356 = vmatpush.bf16.msra.mxu1 %v677_v7  ;;  %v765_v15 = vld [vmem:[#allocation5 + $0x58] sm:$0xf0]  ;;  %v635_v16 = vor.u32 %v749_v13, %v634_v12  ;;  %v630_v18 = vld [vmem:[#allocation5 + $0x40] sm:$0xf]  ;;  %v748_v19 = vld [vmem:[#allocation5 + $0x44] sm:$0xf0] }
  0x19   :  { %v669_v17 = vor.u32 %v765_v15, %v668_v14  ;;  %v664_v20 = vld [vmem:[#allocation5 + $0x44] sm:$0xf]  ;;  %v764_v21 = vld [vmem:[#allocation5 + $0x48] sm:$0xf0]  ;;  %v631_v22 = vor.u32 %v748_v19, %v630_v18  ;;  %v626_v23 = vld [vmem:[#allocation5 + $0x30] sm:$0xf] }
  0x1a   :  { %v665_v24 = vor.u32 %v764_v21, %v664_v20  ;;  %v747_v25 = vld [vmem:[#allocation5 + $0x34] sm:$0xf0]  ;;  %v660_v26 = vld [vmem:[#allocation5 + $0x34] sm:$0xf]  ;;  %v763_v27 = vld [vmem:[#allocation5 + $0x38] sm:$0xf0] }
  0x1b   :  { %170 = vmatpush.bf16.msra.mxu0 %v639_v10  ;;  %v627_v28 = vor.u32 %v747_v25, %v626_v23  ;;  %v661_v29 = vor.u32 %v763_v27, %v660_v26  ;;  %v622_v30 = vld [vmem:[#allocation5 + $0x20] sm:$0xf]  ;;  %v746_v31 = vld [vmem:[#allocation5 + $0x24] sm:$0xf0]  ;;  %v656_v32 = vld [vmem:[#allocation5 + $0x24] sm:$0xf] }
  0x1c   :  { %357 = vmatpush.bf16.msra.mxu1 %v673_v11  ;;  %v762_v33 = vld [vmem:[#allocation5 + $0x28] sm:$0xf0]  ;;  %v623_v34 = vor.u32 %v746_v31, %v622_v30  ;;  %v618_v36 = vld [vmem:[#allocation5 + $0x10] sm:$0xf]  ;;  %v745_v37 = vld [vmem:[#allocation5 + $0x14] sm:$0xf0] }
  0x1d   :  { %v657_v35 = vor.u32 %v762_v33, %v656_v32  ;;  %v652_v38 = vld [vmem:[#allocation5 + $0x14] sm:$0xf]  ;;  %v761_v39 = vld [vmem:[#allocation5 + $0x18] sm:$0xf0]  ;;  %v619_v40 = vor.u32 %v745_v37, %v618_v36  ;;  %v614_v42 = vld [vmem:[#allocation5] sm:$0xf] }
  0x1e   :  { %v653_v41 = vor.u32 %v761_v39, %v652_v38  ;;  %v744_v43 = vld [vmem:[#allocation5 + $0x4] sm:$0xf0]  ;;  %v648_v44 = vld [vmem:[#allocation5 + $0x4] sm:$0xf]  ;;  %v760_v45 = vld [vmem:[#allocation5 + $0x8] sm:$0xf0] }
  0x1f   :  { %171 = vmatpush.bf16.msra.mxu0 %v635_v16  ;;  %v615_v46 = vor.u32 %v744_v43, %v614_v42  ;;  %v82_v47 = vld [vmem:[#allocation2] sm:$0xff]  ;;  %v83_v48 = vld [vmem:[#allocation2 + $0x8] sm:$0xff]  ;;  %v649_v49 = vor.u32 %v760_v45, %v648_v44  ;;  %v785_v51 = vld [vmem:[#allocation7] ss:$0 sm:$0xff]  ;;  %s932_s15 = smov [#allocation10]   ;;  %s597_s19 = sshll.u32 %s1106_s5, 4  ;;  %s598_s19 = int_to_ptr.hbm [resolvable:$true] %s597_s19 }
  0x20   :  { %358 = vmatpush.bf16.msra.mxu1 %v669_v17  ;;  %v84_v50 = vpack.c.bf16 %v83_v48, %v82_v47  ;;  %v786_v52 = vld [vmem:[#allocation7 + $0x1] ss:$0 sm:$0xff]  ;;  %v774_v61 = vld [vmem:[#allocation8 + $0x70] sm:$0xff]  ;;  %v773_v1 = vld [vmem:[#allocation8 + $0x68] sm:$0xff]  ;;  %s595_s16 = sshll.u32 %s932_s15, 4  ;;  %s596_s16 = int_to_ptr.vmem [resolvable:$true] %s595_s16 }
  0x21   :  { %v775_v54 = vld [vmem:[#allocation8 + $0x78] sm:$0xff]  ;;  %v758_v62 = vld [vmem:[#allocation8 + $0x30] sm:$0xff]  ;;  %v757_v2 = vld [vmem:[#allocation8 + $0x28] sm:$0xff] }
  0x22   :  { %v759_v55 = vld [vmem:[#allocation8 + $0x38] sm:$0xff]  ;;  %507 = vmatpush.bf16.msra.mxu2 %v775_v54  ;;  %v772_v9 = vld [vmem:[#allocation8 + $0x60] sm:$0xff]  ;;  %v770_v32 = vld [vmem:[#allocation8 + $0x50] sm:$0xff] }
  0x23   :  { %172 = vmatpush.bf16.msra.mxu0 %v631_v22  ;;  %569 = vmatpush.bf16.msra.mxu3 %v759_v55  ;;  %v756_v10 = vld [vmem:[#allocation8 + $0x20] sm:$0xff]  ;;  %v755_v25 = vld [vmem:[#allocation8 + $0x18] sm:$0xff]  ;;  %v754_v33 = vld [vmem:[#allocation8 + $0x10] sm:$0xff] }
  0x24   :  { %359 = vmatpush.bf16.msra.mxu1 %v665_v24  ;;  %v771_v24 = vld [vmem:[#allocation8 + $0x58] sm:$0xff] }
  0x26   :  { %508 = vmatpush.bf16.msra.mxu2 %v774_v61 }
  0x27   :  { %173 = vmatpush.bf16.msra.mxu0 %v627_v28  ;;  %570 = vmatpush.bf16.msra.mxu3 %v758_v62 }
  0x28   :  { %360 = vmatpush.bf16.msra.mxu1 %v661_v29 }
  0x2a   :  { %509 = vmatpush.bf16.msra.mxu2 %v773_v1 }
  0x2b   :  { %174 = vmatpush.bf16.msra.mxu0 %v623_v34  ;;  %571 = vmatpush.bf16.msra.mxu3 %v757_v2 }
  0x2c   :  { %361 = vmatpush.bf16.msra.mxu1 %v657_v35 }
  0x2e   :  { %510 = vmatpush.bf16.msra.mxu2 %v772_v9 }
  0x2f   :  { %175 = vmatpush.bf16.msra.mxu0 %v619_v40  ;;  %572 = vmatpush.bf16.msra.mxu3 %v756_v10 }
  0x30   :  { %362 = vmatpush.bf16.msra.mxu1 %v653_v41 }
  0x32   :  { %511 = vmatpush.bf16.msra.mxu2 %v771_v24 }
  0x33   :  { %176 = vmatpush.bf16.msra.mxu0 %v615_v46  ;;  %573 = vmatpush.bf16.msra.mxu3 %v755_v25 }
  0x34   :  { %363 = vmatpush.bf16.msra.mxu1 %v649_v49 }
  0x36   :  { %177 = vmatmul.bf16.vlgmr.msra.gmra.mxu0 %v84_v50  ;;  %512 = vmatpush.bf16.msra.mxu2 %v770_v32 }
  0x37   :  { %364 = vmatmul.bf16.vlgmr.msra.gmra.mxu1 %v84_v50  ;;  %574 = vmatpush.bf16.msra.mxu3 %v754_v33  ;;  %v769_v50 = vld [vmem:[#allocation8 + $0x48] sm:$0xff] }
  0x3a   :  { %513 = vmatpush.bf16.msra.mxu2 %v769_v50 }
  0xb3   :  { %v178_v53 = vpop.f32.mrf.mxu0 }
  0xb4   :  { %v981_v56 = vadd.f32 %v785_v51, %v178_v53  ;;  %v365_v57 = vpop.f32.mrf.mxu1 }
  0xb5   :  { %v983_v58 = vadd.f32 %v786_v52, %v365_v57 }
  0xb6   :  { %v986_v59 = vmul.f32 0.70710677, %v981_v56 }
  0xb7   :  { %v989_v60 = vmul.f32 0.70710677, %v983_v58 }
  0xb8   :  { %v187_v63 = vmul.f32 %v986_v59, %v986_v59 }
  0xb9   :  { %v374_v0 = vmul.f32 %v989_v60, %v989_v60 }
  0xba   :  { %v995_v3 = vmin.f32 %v187_v63, 16.0 }
  0xbb   :  { %v997_v4 = vmin.f32 %v374_v0, 16.0  ;;  %v180_v5 = vpop.f32.mrf.mxu0 }
  0xbc   :  { %v189_v6 = vmul.f32 2.1237322e-06, %v995_v3  ;;  %v1000_v7 = vadd.f32 %v785_v51, %v180_v5  ;;  %v367_v8 = vpop.f32.mrf.mxu1  ;;  %v200_v14 = vmul.f32 3.8918573e-05, %v995_v3  ;;  %v753_v51 = vld [vmem:[#allocation8 + $0x8] sm:$0xff] }
  0xbd   :  { %v376_v11 = vmul.f32 2.1237322e-06, %v997_v4  ;;  %v1003_v12 = vadd.f32 %v786_v52, %v367_v8  ;;  %v387_v13 = vmul.f32 3.8918573e-05, %v997_v4  ;;  %575 = vmatpush.bf16.msra.mxu3 %v753_v51  ;;  %v752_v8 = vld [vmem:[#allocation8] sm:$0xff] }
  0xbe   :  { %v190_v15 = vadd.f32 0.00028619796, %v189_v6  ;;  %v1008_v16 = vmul.f32 0.70710677, %v1000_v7  ;;  %v201_v21 = vadd.f32 0.001143296, %v200_v14 }
  0xbf   :  { %v377_v17 = vadd.f32 0.00028619796, %v376_v11  ;;  %v1011_v18 = vmul.f32 0.70710677, %v1003_v12  ;;  %v388_v20 = vadd.f32 0.001143296, %v387_v13 }
  0xc0   :  { %v227_v19 = vmul.f32 %v1008_v16, %v1008_v16  ;;  %v191_v26 = vmul.f32 %v190_v15, %v995_v3  ;;  %v202_v29 = vmul.f32 %v201_v21, %v995_v3  ;;  %v768_v6 = vld [vmem:[#allocation8 + $0x40] sm:$0xff] }
  0xc1   :  { %v378_v22 = vmul.f32 %v377_v17, %v997_v4  ;;  %v414_v23 = vmul.f32 %v1011_v18, %v1011_v18  ;;  %v389_v28 = vmul.f32 %v388_v20, %v997_v4  ;;  %514 = vmatpush.bf16.msra.mxu2 %v768_v6  ;;  %576 = vmatpush.bf16.msra.mxu3 %v752_v8 }
  0xc2   :  { %v1019_v27 = vmin.f32 %v227_v19, 16.0  ;;  %v203_v36 = vadd.f32 0.014752088, %v202_v29  ;;  %v192_v40 = vadd.f32 0.0036580483, %v191_v26 }
  0xc3   :  { %v379_v30 = vadd.f32 0.0036580483, %v378_v22  ;;  %v1023_v31 = vmin.f32 %v414_v23, 16.0  ;;  %v390_v35 = vadd.f32 0.014752088, %v389_v28 }
  0xc4   :  { %v229_v34 = vmul.f32 2.1237322e-06, %v1019_v27  ;;  %v240_v39 = vmul.f32 3.8918573e-05, %v1019_v27  ;;  %v204_v43 = vmul.f32 %v203_v36, %v995_v3  ;;  %v193_v54 = vmul.f32 %v192_v40, %v995_v3 }
  0xc5   :  { %v416_v37 = vmul.f32 2.1237322e-06, %v1023_v31  ;;  %v427_v38 = vmul.f32 3.8918573e-05, %v1023_v31  ;;  %v380_v41 = vmul.f32 %v379_v30, %v997_v4  ;;  %v391_v42 = vmul.f32 %v390_v35, %v997_v4 }
  0xc6   :  { %v230_v46 = vadd.f32 0.00028619796, %v229_v34  ;;  %v205_v48 = vadd.f32 0.112945676, %v204_v43  ;;  %v241_v53 = vadd.f32 0.001143296, %v240_v39 }
  0xc7   :  { %v417_v44 = vadd.f32 0.00028619796, %v416_v37  ;;  %v428_v45 = vadd.f32 0.001143296, %v427_v38  ;;  %v392_v47 = vadd.f32 0.112945676, %v391_v42 }
  0xc8   :  { %v381_v55 = vadd.f32 0.05243302, %v380_v41  ;;  %v206_v61 = vmul.f32 %v205_v48, %v995_v3  ;;  %v242_v0 = vmul.f32 %v241_v53, %v1019_v27  ;;  %v231_v1 = vmul.f32 %v230_v46, %v1019_v27 }
  0xc9   :  { %v418_v49 = vmul.f32 %v417_v44, %v1023_v31  ;;  %v429_v52 = vmul.f32 %v428_v45, %v1023_v31  ;;  %v393_v57 = vmul.f32 %v392_v47, %v997_v4  ;;  %v194_v11 = vadd.f32 0.05243302, %v193_v54 }
  0xca   :  { %v207_v5 = vadd.f32 0.4994258, %v206_v61  ;;  %v243_v10 = vadd.f32 0.014752088, %v242_v0  ;;  %v382_v13 = vmul.f32 %v381_v55, %v997_v4  ;;  %v232_v21 = vadd.f32 0.0036580483, %v231_v1 }
  0xcb   :  { %v419_v62 = vadd.f32 0.0036580483, %v418_v49  ;;  %v430_v63 = vadd.f32 0.014752088, %v429_v52  ;;  %v394_v2 = vadd.f32 0.4994258, %v393_v57  ;;  %v195_v25 = vmul.f32 %v194_v11, %v995_v3 }
  0xcc   :  { %v208_v15 = vmul.f32 %v207_v5, %v995_v3  ;;  %v244_v20 = vmul.f32 %v243_v10, %v1019_v27  ;;  %v383_v26 = vadd.f32 0.18741608, %v382_v13  ;;  %v233_v32 = vmul.f32 %v232_v21, %v1019_v27 }
  0xcd   :  { %v431_v9 = vmul.f32 %v430_v63, %v1023_v31  ;;  %v395_v14 = vmul.f32 %v394_v2, %v997_v4  ;;  %v420_v17 = vmul.f32 %v419_v62, %v1023_v31  ;;  %v196_v34 = vadd.f32 0.18741608, %v195_v25 }
  0xce   :  { %v1045_v23 = vadd.f32 1.0, %v208_v15  ;;  %v245_v28 = vadd.f32 0.112945676, %v244_v20  ;;  %v384_v35 = vmul.f32 %v383_v26, %v997_v4  ;;  %v234_v40 = vadd.f32 0.05243302, %v233_v32 }
  0xcf   :  { %v432_v19 = vadd.f32 0.112945676, %v431_v9  ;;  %v396_v22 = vadd.f32 1.0, %v395_v14  ;;  %v421_v29 = vadd.f32 0.05243302, %v420_v17  ;;  %v197_v44 = vmul.f32 %v196_v34, %v995_v3 }
  0xd0   :  { %v246_v36 = vmul.f32 %v245_v28, %v1019_v27  ;;  %v385_v45 = vadd.f32 1.1283791, %v384_v35  ;;  %v235_v49 = vmul.f32 %v234_v40, %v1019_v27  ;;  %v221_v8 = vand.u32 2147483648, %v1045_v23 }
  0xd1   :  { %v433_v24 = vmul.f32 %v432_v19, %v1023_v31  ;;  %788 = vrcp.f32 %v396_v22  ;;  %v422_v37 = vmul.f32 %v421_v29, %v1023_v31  ;;  %v408_v50 = vand.u32 2147483648, %v396_v22 }
  0xd2   :  { %790 = vrcp.f32 %v1045_v23  ;;  %v247_v41 = vadd.f32 0.4994258, %v246_v36  ;;  %v406_v53 = vand.u32 2147483647, %v396_v22  ;;  %v198_v55 = vadd.f32 1.1283791, %v197_v44 }
  0xd3   :  { %v434_v30 = vadd.f32 0.4994258, %v433_v24  ;;  %v423_v47 = vadd.f32 0.18741608, %v422_v37  ;;  %v386_v57 = vmul.f32 %v385_v45, %v989_v60  ;;  %vm402_vm1 = vweird.f32 %v396_v22 }
  0xd4   :  { %v248_v48 = vmul.f32 %v247_v41, %v1019_v27  ;;  %v409_v0 = vor.u32 1.1754944e-38, %v408_v50  ;;  %v236_v5 = vadd.f32 0.18741608, %v235_v49  ;;  %vm407_vm4 = vcmp.eq.f32.partialorder %v406_v53, 8.507059e+37 }
  0xd5   :  { %v435_v33 = vmul.f32 %v434_v30, %v1023_v31  ;;  %v424_v62 = vmul.f32 %v423_v47, %v1023_v31  ;;  %vm215_vm5 = vweird.f32 %v1045_v23  ;;  %v219_v31 = vand.u32 2147483647, %v1045_v23 }
  0xd6   :  { %v1062_v54 = vadd.f32 1.0, %v248_v48  ;;  %v237_v21 = vmul.f32 %v236_v5, %v1019_v27  ;;  %v199_v25 = vmul.f32 %v198_v55, %v986_v59  ;;  %v370_v41 = vmul.f32 0.5, %v983_v58 }
  0xd7   :  { %v1055_v38 = vadd.f32 1.0, %v435_v33  ;;  %v789_v39 = vpop.eup %788  ;;  %v425_v10 = vadd.f32 1.1283791, %v424_v62  ;;  %vm220_vm9 = vcmp.eq.f32.partialorder %v219_v31, 8.507059e+37  ;;  %v184_v58 = vmul.f32 0.5, %v1000_v7 }
  0xd8   :  { %v791_v42 = vpop.eup %790  ;;  %v398_v43 = vmul.f32 %v789_v39, %v396_v22  ;;  %vm403_vm0 = vweird.f32 %v789_v39  ;;  %v222_v22 = vor.u32 1.1754944e-38, %v221_v8  ;;  %v238_v34 = vadd.f32 1.1283791, %v237_v21 }
  0xd9   :  { %792 = vrcp.f32 %v1055_v38  ;;  %v211_v46 = vmul.f32 %v791_v42, %v1045_v23  ;;  %vm404_vm2 = vmor %vm402_vm1, %vm403_vm0  ;;  %vm216_vm3 = vweird.f32 %v791_v42  ;;  %v446_v11 = vand.u32 2147483647, %v1055_v38 }
  0xda   :  { %v399_v4 = vsub.f32 1.0, %v398_v43  ;;  %794 = vrcp.f32 %v1062_v54  ;;  %v448_v13 = vand.u32 2147483648, %v1055_v38  ;;  %vm1073_vm6 = vmor %vm215_vm5, %vm216_vm3  ;;  %vm442_vm8 = vweird.f32 %v1055_v38 }
  0xdb   :  { %v212_v51 = vsub.f32 1.0, %v211_v46  ;;  %v426_v26 = vmul.f32 %v425_v10, %v1011_v18  ;;  %vm447_vm11 = vcmp.eq.f32.partialorder %v446_v11, 8.507059e+37  ;;  %v259_v35 = vand.u32 2147483647, %v1062_v54 }
  0xdc   :  { %v400_v52 = vmul.f32 %v789_v39, %v399_v4  ;;  %v449_v28 = vor.u32 1.1754944e-38, %v448_v13  ;;  %v261_v36 = vand.u32 2147483648, %v1062_v54  ;;  %vm255_vm13 = vweird.f32 %v1062_v54 }
  0xdd   :  { %v213_v3 = vmul.f32 %v791_v42, %v212_v51  ;;  %v371_v43 = vmul.f32 0.5, %v1003_v12  ;;  %vm260_vm15 = vcmp.eq.f32.partialorder %v259_v35, 8.507059e+37 }
  0xde   :  { %v401_v63 = vadd.f32 %v789_v39, %v400_v52  ;;  %v262_v44 = vor.u32 1.1754944e-38, %v261_v36 }
  0xdf   :  { %v793_v61 = vpop.eup %792  ;;  %v214_v2 = vadd.f32 %v791_v42, %v213_v3 }
  0xe0   :  { %v438_v1 = vmul.f32 %v793_v61, %v1055_v38  ;;  %v405_v6 = vsel %vm404_vm2, %v789_v39, %v401_v63  ;;  %vm443_vm7 = vweird.f32 %v793_v61  ;;  %v795_v20 = vpop.eup %794 }
  0xe1   :  { %v410_v60 = vsel %vm407_vm4, %v409_v0, %v405_v6  ;;  %v218_v19 = vsel %vm1073_vm6, %v791_v42, %v214_v2  ;;  %v251_v24 = vmul.f32 %v795_v20, %v1062_v54  ;;  %vm444_vm10 = vmor %vm442_vm8, %vm443_vm7  ;;  %vm256_vm12 = vweird.f32 %v795_v20 }
  0xe2   :  { %v439_v9 = vsub.f32 1.0, %v438_v1  ;;  %v411_v15 = vmul.f32 %v410_v60, %v386_v57  ;;  %v223_v29 = vsel %vm220_vm9, %v222_v22, %v218_v19  ;;  %v239_v42 = vmul.f32 %v238_v34, %v1008_v16  ;;  %vm257_vm14 = vmor %vm255_vm13, %vm256_vm12 }
  0xe3   :  { %v252_v33 = vsub.f32 1.0, %v251_v24  ;;  %v224_v38 = vmul.f32 %v223_v29, %v199_v25  ;;  %v183_v54 = vmul.f32 0.5, %v981_v56 }
  0xe4   :  { %v440_v17 = vmul.f32 %v793_v61, %v439_v9  ;;  %v678_v30 = vclamps-f32 %v411_v15, 1.0 }
  0xe5   :  { %v253_v39 = vmul.f32 %v795_v20, %v252_v33  ;;  %v644_v46 = vclamps-f32 %v224_v38, 1.0 }
  0xe6   :  { %v441_v23 = vadd.f32 %v793_v61, %v440_v17  ;;  %v454_v40 = vadd.f32 1.0, %v678_v30 }
  0xe7   :  { %v254_v18 = vadd.f32 %v795_v20, %v253_v39  ;;  %v267_v53 = vadd.f32 1.0, %v644_v46 }
  0xe8   :  { %v445_v32 = vsel %vm444_vm10, %v793_v61, %v441_v23  ;;  %v456_v48 = vmul.f32 %v454_v40, %v370_v41  ;;  %v787_v61 = vld [vmem:[%s1105_s4] ss:$0 sm:$0xff] }
  0xe9   :  { %v450_v27 = vsel %vm447_vm11, %v449_v28, %v445_v32  ;;  %v258_v47 = vsel %vm257_vm14, %v795_v20, %v254_v18  ;;  %v269_v12 = vmul.f32 %v267_v53, %v183_v54 }
  0xea   :  { %v451_v37 = vmul.f32 %v450_v27, %v426_v26  ;;  %v263_v4 = vsel %vm260_vm15, %v262_v44, %v258_v47 }
  0xeb   :  { %v264_v50 = vmul.f32 %v263_v4, %v239_v42 }
  0xec   :  { %v679_v59 = vclamps-f32 %v451_v37, 1.0 }
  0xed   :  { %v645_v52 = vclamps-f32 %v264_v50, 1.0 }
  0xee   :  { %v455_v45 = vadd.f32 1.0, %v679_v59 }
  0xef   :  { %v268_v16 = vadd.f32 1.0, %v645_v52 }
  0xf0   :  { %v457_v49 = vmul.f32 %v455_v45, %v371_v43 }
  0xf1   :  { %v270_v55 = vmul.f32 %v268_v16, %v184_v58 }
  0xf2   :  { %v458_v51 = vpack.c.bf16 %v457_v49, %v456_v48 }
  0xf3   :  { %v271_v57 = vpack.c.bf16 %v270_v55, %v269_v12 }
  0xf4   :  { %515 = vmatmul.bf16.vlgmr.msra.gmra.mxu2 %v458_v51 }
  0xf5   :  { %577 = vmatmul.bf16.vlgmr.msra.gmra.mxu3 %v271_v57 }
 0x177   :  { %v516_v3 = vpop.f32.mrf.mxu2 }
 0x178   :  { %v578_v62 = vpop.f32.mrf.mxu3 }
 0x179   :  { %v579_v63 = vadd.f32 %v578_v62, %v516_v3 }
 0x17b   :  { %v587_v0 = vadd.f32 %v787_v61, %v579_v63 }
 0x17d   :  { %589 = vst [vmem:[#allocation10] sm:$0xff] %v587_v0 }
 0x17f   :  { %v518_v1 = vpop.f32.mrf.mxu2 }
 0x180   :  { %v580_v2 = vpop.f32.mrf.mxu3 }
 0x181   :  { %v581_v56 = vadd.f32 %v580_v2, %v518_v1 }
 0x183   :  { %v588_v7 = vadd.f32 %v787_v61, %v581_v56 }
 0x185   :  { %590 = vst [vmem:[#allocation10 + $0x8] sm:$0xff] %v588_v7 }
 0x186   :  { %603 = dma.vmem_to_hbm [thread:$0]  %s596_s16, 256, %s598_s19, [#allocation4], %s925_s26, %s925_s26, %s926_s27  }
 0x187   :  { %922 = dma.done.wait [#allocation4], 256  }
 0x188   :  { %923 = vsyncadd [#allocation4], 4294967040 }
 0x189   :  { %608 = vsyncpa [#allocation3], 1 }
 0x18a   :  { %609 = vsyncpa [#allocation6], 1 }
 0x18b   :  { %610 = vsyncpa [#allocation9], 1 }
 0x18c   :  { %611 = vsyncpa [#allocation4], 1 }

</bundles_post_ra>
